<compile_context>
chip_gen: v5e
topology: v5e:2x2
jax: 0.10.0
libtpu: 0.0.40
codegen_flags: <defaults>
</compile_context>

<pallas_src>
import functools

import jax
import jax.numpy as jnp
from jax.experimental import pallas as pl
from jax.experimental.pallas import tpu as pltpu

BN_EPS = 1e-5
LANE = 128


def _round_up(a, b):
    return (a + b - 1) // b * b


def _vmem_capacity_bytes():
    # Per-TensorCore VMEM capacity: 128 MiB on v5e/v6e, 64 MiB on v7x.
    try:
        cap = int(pltpu.get_tpu_info().vmem_capacity_bytes)
        if cap > 0:
            return cap
    except Exception:
        pass
    return 64 * 1024 * 1024  # assume the tightest case (v7x) if the query fails


def _mxu_width():
    # MXU output-tile width: 256 on v6e/v7x, 128 on v5e.  Only used to pick the
    # matmul association, so a wrong guess is a minor perf (never correctness)
    # issue; default to 256 (modern chips).
    try:
        info = pltpu.get_tpu_info()
        for name in ("mxu_column_size", "mxu_size", "mxu_width",
                     "mxu_contracting_size"):
            v = getattr(info, name, None)
            if v:
                v = int(v)
                if 0 < v <= 1024:
                    return v
    except Exception:
        pass
    return 256


def _pick_pass1_tile(n_pad, cin, cout_pad, resident_bytes, ax_first, budget):
    """Rows per pass-1 tile: multiple of 128 that divides n_pad, >= 2 tiles."""
    k = n_pad // 128
    # Per-row VMEM bytes:
    #   2x-buffered int8 A row  + its in-kernel bf16 cast temporary
    #   2x-buffered bf16 H out  + f32 h / h*h temporaries
    #   2x-buffered lane-padded f32 dinv row
    per_row = (2 * n_pad + 2 * n_pad) + (4 * cout_pad + 8 * cout_pad) + 1024
    if ax_first:
        per_row += 6 * cin  # f32 + bf16 (A @ Xs) intermediates
    # Resident operands budgeted at 2 buffers (defensive, even though they are
    # requested single-buffered) + the small per-tile stats output blocks.
    fixed = 2 * resident_bytes + 4 * 2 * cout_pad * 4
    avail = budget - fixed
    d = max(1, min(8, avail // (per_row * 128)))  # tile = 128*d rows, <= 1024
    if k >= 2:
        d = min(d, k // 2)                        # >= 2 tiles: keep both v7x TCs busy
    d = max(1, d)
    while k % d:                                  # exact tiling of n_pad (no waste)
        d -= 1
    return 128 * d


def _pick_pass2_tile(n_pad, cout_pad, budget):
    """Rows per pass-2 tile: pure HBM stream, so use much larger tiles."""
    k = n_pad // 128
    per_128 = 128 * cout_pad * (2 * 2 + 2 * 4)    # 2x bf16 in + 2x f32 out buffers
    d = max(1, min(16, budget // max(per_128, 1)))
    d = min(d, k)
    while k % d:
        d -= 1
    return 128 * d


def _write_h_and_stats(h, h_ref, stats_ref):
    h_ref[...] = h.astype(h_ref.dtype)            # bf16 H (halves interpass HBM)
    s1 = jnp.sum(h, axis=0, keepdims=True)        # stats from the f32 accumulator
    s2 = jnp.sum(h * h, axis=0, keepdims=True)
    stats_ref[0] = jnp.concatenate([s1, s2], axis=0)   # single (2, C) store


def _gcn_pass1_ax_kernel(a_ref, xs_ref, w_ref, dinv_ref, h_ref, stats_ref):
    # H_tile = (dinv_row * ((A+I)_tile @ (dinv*X))) @ W   (bf16 MXU, f32 acc)
    a = a_ref[...].astype(jnp.bfloat16)           # int8 -> bf16 (exact: 0/1/2)
    ax = jnp.dot(a, xs_ref[...], preferred_element_type=jnp.float32)
    ax = ax * dinv_ref[...]                       # normalize BEFORE bf16 re-cast
    h = jnp.dot(ax.astype(jnp.bfloat16), w_ref[...],
                preferred_element_type=jnp.float32)
    _write_h_and_stats(h, h_ref, stats_ref)


def _gcn_pass1_xw_kernel(a_ref, xw_ref, dinv_ref, h_ref, stats_ref):
    # H_tile = dinv_row * ((A+I)_tile @ XW),  XW = (dinv*X)@W precomputed once.
    a = a_ref[...].astype(jnp.bfloat16)           # int8 -> bf16 (exact)
    h = jnp.dot(a, xw_ref[...], preferred_element_type=jnp.float32)
    h = h * dinv_ref[...]
    _write_h_and_stats(h, h_ref, stats_ref)


def _bn_relu_kernel(h_ref, ss_ref, o_ref):
    h = h_ref[...].astype(jnp.float32)
    o_ref[...] = jnp.maximum(h * ss_ref[0:1, :] + ss_ref[1:2, :], 0.0)


@functools.partial(jax.jit, static_argnames=("num_nodes",))
def spectral_gcn_layer(x, edge_index, weight, bias, gamma, beta, *, num_nodes):
    """Forward of SpectralGCNLayer.

    x: [N, Cin], edge_index: [2, E] int32 (row 0 = src, row 1 = dst),
    weight: [Cin, Cout], bias/gamma/beta: [Cout].  Returns [N, Cout] float32.

    NOTE: BatchNorm1d runs in training mode (biased batch statistics), so the
    GCNConv bias cancels exactly in (H - mean) and is dropped from compute.
    If eval-mode / running statistics are ever used, it must be re-added.
    """
    del bias  # mathematically dead under batch-statistics BatchNorm

    N = num_nodes
    Cin = x.shape[1]
    Cout = weight.shape[1]
    Cout_pad = _round_up(Cout, LANE)
    N_pad = _round_up(N, LANE)

    cap = _vmem_capacity_bytes()
    budget1 = int(cap * 0.60)      # tile-picking budget (leaves >=10-15% slack)
    limit1 = int(cap * 0.90)       # scoped-VMEM hard limit handed to Mosaic

    # ---- plain-JAX glue: (A+I) built directly in int8, degrees, D^-1/2 ----
    # TODO(synk): for very large / static graphs replace this dense O(N^2)
    # scatter with a CSR + scalar-prefetch gather formulation.
    src = edge_index[0]
    dst = edge_index[1]
    adj = jnp.zeros((N_pad, N_pad), dtype=jnp.int8)
    adj = adj.at[dst, src].set(1)             # out[i] aggregates src j of edge j->i
    diag = jnp.arange(N)
    adj = adj.at[diag, diag].add(1)           # self loops (real nodes only)
    deg = jnp.sum(adj, axis=1, dtype=jnp.float32)        # padded rows: 0
    dinv = jnp.where(deg > 0, jax.lax.rsqrt(deg), 0.0)   # [N_pad]
    dinv_col = dinv[:, None]                              # [N_pad, 1] f32

    xp = jnp.zeros((N_pad, Cin), jnp.float32).at[:N].set(x.astype(jnp.float32))
    xn = dinv[:, None] * xp                               # column half of the norm
    w_f32 = (jnp.zeros((Cin, Cout_pad), jnp.float32)
             .at[:, :Cout].set(weight.astype(jnp.float32)))

    # ---- matmul association: count MXU output tiles of the N^2-sized matmul ----
    mxu = _mxu_width()
    ax_first = (-(-Cin // mxu)) < (-(-Cout_pad // mxu))   # strict: ties -> XW path
    if ax_first:
        xs = xn.astype(jnp.bfloat16)                      # [N_pad, Cin]
        w_bf = w_f32.astype(jnp.bfloat16)                 # [Cin, Cout_pad]
        resident = N_pad * Cin * 2 + Cin * Cout_pad * 2
    else:
        xw = (xn @ w_f32).astype(jnp.bfloat16)            # [N_pad, Cout_pad], once
        resident = N_pad * Cout_pad * 2

    TM = _pick_pass1_tile(N_pad, Cin, Cout_pad, resident, ax_first, budget1)
    num_tiles = N_pad // TM

    cparams1 = pltpu.CompilerParams(dimension_semantics=("parallel",),
                                    vmem_limit_bytes=limit1)
    out_shapes = (jax.ShapeDtypeStruct((N_pad, Cout_pad), jnp.bfloat16),
                  jax.ShapeDtypeStruct((num_tiles, 2, Cout_pad), jnp.float32))
    out_specs = (pl.BlockSpec((TM, Cout_pad), lambda i: (i, 0)),
                 pl.BlockSpec((1, 2, Cout_pad), lambda i: (i, 0, 0)))
    a_spec = pl.BlockSpec((TM, N_pad), lambda i: (i, 0))        # int8 row tile
    dinv_spec = pl.BlockSpec((TM, 1), lambda i: (i, 0))

    # ---- pass 1: row-tiled GCNConv + per-tile partial batch statistics ----
    if ax_first:
        h, stats = pl.pallas_call(
            _gcn_pass1_ax_kernel,
            out_shape=out_shapes, grid=(num_tiles,),
            in_specs=[a_spec,
                      pl.BlockSpec((N_pad, Cin), lambda i: (0, 0),
                                   pipeline_mode=pl.Buffered(1)),      # resident
                      pl.BlockSpec((Cin, Cout_pad), lambda i: (0, 0),
                                   pipeline_mode=pl.Buffered(1)),      # resident
                      dinv_spec],
            out_specs=out_specs, compiler_params=cparams1,
        )(adj, xs, w_bf, dinv_col)
    else:
        h, stats = pl.pallas_call(
            _gcn_pass1_xw_kernel,
            out_shape=out_shapes, grid=(num_tiles,),
            in_specs=[a_spec,
                      pl.BlockSpec((N_pad, Cout_pad), lambda i: (0, 0),
                                   pipeline_mode=pl.Buffered(1)),      # resident
                      dinv_spec],
            out_specs=out_specs, compiler_params=cparams1,
        )(adj, xw, dinv_col)

    # ---- fold batch statistics into per-channel scale/shift (tiny, O(C)) ----
    tot = jnp.sum(stats, axis=0)                       # (2, Cout_pad)
    mean = tot[0] / N                                  # padded rows contribute 0
    var = jnp.maximum(tot[1] / N - mean * mean, 0.0)   # biased batch variance
    inv_std = jax.lax.rsqrt(var + BN_EPS)
    g = jnp.zeros((Cout_pad,), jnp.float32).at[:Cout].set(gamma.astype(jnp.float32))
    b = jnp.zeros((Cout_pad,), jnp.float32).at[:Cout].set(beta.astype(jnp.float32))
    scale = g * inv_std
    shift = b - mean * scale
    ss = jnp.stack([scale, shift], axis=0)             # (2, Cout_pad)

    # ---- pass 2: normalize + ReLU, large lane-dense row tiles ----
    limit2 = min(limit1, 32 * 1024 * 1024)
    TM2 = _pick_pass2_tile(N_pad, Cout_pad, int(limit2 * 0.75))
    out = pl.pallas_call(
        _bn_relu_kernel,
        out_shape=jax.ShapeDtypeStruct((N_pad, Cout_pad), jnp.float32),
        grid=(N_pad // TM2,),
        in_specs=[pl.BlockSpec((TM2, Cout_pad), lambda i: (i, 0)),
                  pl.BlockSpec((2, Cout_pad), lambda i: (0, 0),
                               pipeline_mode=pl.Buffered(1))],
        out_specs=pl.BlockSpec((TM2, Cout_pad), lambda i: (i, 0)),
        compiler_params=pltpu.CompilerParams(
            dimension_semantics=("parallel",), vmem_limit_bytes=limit2),
    )(h, ss)

    return out[:N, :Cout]


def _reference(x, edge_index, weight, bias, gamma, beta, num_nodes):
    """Pure-JAX f32 reference (matches the PyTorch module, bias included)."""
    N = num_nodes
    adj = jnp.zeros((N, N), dtype=jnp.float32)
    adj = adj.at[edge_index[1], edge_index[0]].set(1.0)
    adj = adj + jnp.eye(N, dtype=jnp.float32)
    deg = jnp.sum(adj, axis=1)
    dinv = jnp.where(deg > 0, jax.lax.rsqrt(deg), 0.0)
    a_hat = dinv[:, None] * adj * dinv[None, :]
    h = a_hat @ (x @ weight) + bias[None, :]
    mean = jnp.mean(h, axis=0, keepdims=True)
    var = jnp.mean((h - mean) ** 2, axis=0, keepdims=True)
    y = (h - mean) / jnp.sqrt(var + BN_EPS) * gamma[None, :] + beta[None, :]
    return jnp.maximum(y, 0.0)


if __name__ == "__main__":
    key = jax.random.PRNGKey(0)
    N, Cin, Cout = 16, 4, 8

    k_x, k_w = jax.random.split(key)
    x = jax.random.normal(k_x, (N, Cin), dtype=jnp.float32)

    # ring graph (both directions), deterministic
    idx = jnp.arange(N, dtype=jnp.int32)
    src = jnp.concatenate([idx, (idx + 1) % N])
    dst = jnp.concatenate([(idx + 1) % N, idx])
    edge_index = jnp.stack([src, dst], axis=0)  # [2, 2N]

    # GCNConv parameters: glorot-ish weight [Cin, Cout], zero bias.
    limit = jnp.sqrt(6.0 / (Cin + Cout))
    weight = jax.random.uniform(k_w, (Cin, Cout), jnp.float32, -limit, limit)
    bias = jnp.zeros((Cout,), jnp.float32)

    # BatchNorm1d affine parameters at init: gamma=1, beta=0.
    gamma = jnp.ones((Cout,), jnp.float32)
    beta = jnp.zeros((Cout,), jnp.float32)

    out = spectral_gcn_layer(x, edge_index, weight, bias, gamma, beta, num_nodes=N)
    out = jax.block_until_ready(out)

    ref = _reference(x, edge_index, weight, bias, gamma, beta, N)
    assert out.shape == (N, Cout)
    # Tolerance reflects bf16 MXU inputs / bf16 H intermediate vs f32 reference.
    assert jnp.allclose(out, ref, atol=3e-2, rtol=3e-2), (
        f"max abs diff = {float(jnp.max(jnp.abs(out - ref)))}")
    print("KERNEL_OK")
</pallas_src>

<mosaic_0001>
module attributes {stable_mosaic.version = 11 : i64} {
  func.func @_gcn_pass1_xw_kernel(%arg0: i32, %arg1: memref<128x128xi8, #tpu.memory_space<vmem>>, %arg2: memref<128x128xbf16, #tpu.memory_space<vmem>>, %arg3: memref<128x1xf32, #tpu.memory_space<vmem>>, %arg4: memref<128x128xbf16, #tpu.memory_space<vmem>>, %arg5: memref<1x2x128xf32, #tpu.memory_space<vmem>>) attributes {dimension_semantics = [#tpu.dimension_semantics<parallel>], iteration_bounds = array<i64: 1>, scalar_prefetch = 0 : i64, scratch_operands = 0 : i64, tpu.core_type = #tpu.core_type<tc>, window_params = [{transform_indices = @transform_0, window_bounds = array<i64: 128, 128>}, {pipeline_mode = #tpu.pipeline_mode<synchronous>, transform_indices = @transform_1, window_bounds = array<i64: 128, 128>}, {transform_indices = @transform_2, window_bounds = array<i64: 128, 1>}, {transform_indices = @transform_3, window_bounds = array<i64: 128, 128>}, {transform_indices = @transform_4, window_bounds = array<i64: 1, 2, 128>}]} {
    %c0 = arith.constant 0 : index
    %c0_0 = arith.constant 0 : index
    %0 = vector.load %arg1[%c0, %c0_0] : memref<128x128xi8, #tpu.memory_space<vmem>>, vector<128x128xi8>
    %1 = arith.sitofp %0 : vector<128x128xi8> to vector<128x128xbf16>
    %c0_1 = arith.constant 0 : index
    %c0_2 = arith.constant 0 : index
    %2 = vector.load %arg2[%c0_1, %c0_2] : memref<128x128xbf16, #tpu.memory_space<vmem>>, vector<128x128xbf16>
    %cst = arith.constant dense<0.000000e+00> : vector<128x128xf32>
    %3 = tpu.matmul %1, %2, %cst {dimension_numbers = #tpu.dot_dimension_numbers<[1], [0], [0], [1], [0, 0, 1, 1], [], []>} : vector<128x128xbf16>, vector<128x128xbf16>, vector<128x128xf32> -> vector<128x128xf32>
    %c0_3 = arith.constant 0 : index
    %c0_4 = arith.constant 0 : index
    %4 = vector.load %arg3[%c0_3, %c0_4] : memref<128x1xf32, #tpu.memory_space<vmem>>, vector<128x1xf32>
    %5 = vector.broadcast %4 : vector<128x1xf32> to vector<128x128xf32>
    %6 = arith.mulf %3, %5 : vector<128x128xf32>
    %7 = arith.truncf %6 : vector<128x128xf32> to vector<128x128xbf16>
    %c0_5 = arith.constant 0 : index
    %c0_6 = arith.constant 0 : index
    %8 = vector.load %arg4[%c0_5, %c0_6] : memref<128x128xbf16, #tpu.memory_space<vmem>>, vector<128x128xbf16>
    tpu.vector_store %arg4[%c0_5, %c0_6], %7 {strides = array<i32>} : memref<128x128xbf16, #tpu.memory_space<vmem>>, vector<128x128xbf16>,
    %cst_7 = arith.constant dense<0.000000e+00> : vector<128xf32>
    %9 = vector.multi_reduction <add>, %6, %cst_7 [0] : vector<128x128xf32> to vector<128xf32>
    %10 = vector.shape_cast %9 : vector<128xf32> to vector<1x128xf32>
    %11 = arith.mulf %6, %6 : vector<128x128xf32>
    %cst_8 = arith.constant dense<0.000000e+00> : vector<128xf32>
    %12 = vector.multi_reduction <add>, %11, %cst_8 [0] : vector<128x128xf32> to vector<128xf32>
    %13 = vector.shape_cast %12 : vector<128xf32> to vector<1x128xf32>
    %14 = tpu.concatenate %10, %13 in 0 : vector<1x128xf32>, vector<1x128xf32> -> vector<2x128xf32>
    %c0_9 = arith.constant 0 : index
    %c0_10 = arith.constant 0 : index
    %c0_11 = arith.constant 0 : index
    %15 = vector.load %arg5[%c0_9, %c0_10, %c0_11] : memref<1x2x128xf32, #tpu.memory_space<vmem>>, vector<1x2x128xf32>
    %16 = vector.shape_cast %15 : vector<1x2x128xf32> to vector<2x128xf32>
    %17 = vector.shape_cast %14 : vector<2x128xf32> to vector<1x2x128xf32>
    tpu.vector_store %arg5[%c0_9, %c0_10, %c0_11], %17 {strides = array<i32>} : memref<1x2x128xf32, #tpu.memory_space<vmem>>, vector<1x2x128xf32>,
    return
  }
  func.func @transform_0(%arg0: i32) -> (i32, i32) {
    %c0_i32 = arith.constant 0 : i32
    %c0_i32_0 = arith.constant 0 : i32
    return %arg0, %c0_i32 : i32, i32
  }
  func.func @transform_1(%arg0: i32) -> (i32, i32) {
    %c0_i32 = arith.constant 0 : i32
    %c0_i32_0 = arith.constant 0 : i32
    %c0_i32_1 = arith.constant 0 : i32
    return %c0_i32, %c0_i32_0 : i32, i32
  }
  func.func @transform_2(%arg0: i32) -> (i32, i32) {
    %c0_i32 = arith.constant 0 : i32
    %c0_i32_0 = arith.constant 0 : i32
    return %arg0, %c0_i32 : i32, i32
  }
  func.func @transform_3(%arg0: i32) -> (i32, i32) {
    %c0_i32 = arith.constant 0 : i32
    %c0_i32_0 = arith.constant 0 : i32
    return %arg0, %c0_i32 : i32, i32
  }
  func.func @transform_4(%arg0: i32) -> (i32, i32, i32) {
    %c0_i32 = arith.constant 0 : i32
    %c0_i32_0 = arith.constant 0 : i32
    %c0_i32_1 = arith.constant 0 : i32
    return %arg0, %c0_i32, %c0_i32_0 : i32, i32, i32
  }
}

module attributes {stable_mosaic.version = 11 : i64} {
  func.func @_bn_relu_kernel(%arg0: i32, %arg1: memref<128x128xbf16, #tpu.memory_space<vmem>>, %arg2: memref<2x128xf32, #tpu.memory_space<vmem>>, %arg3: memref<128x128xf32, #tpu.memory_space<vmem>>) attributes {dimension_semantics = [#tpu.dimension_semantics<parallel>], iteration_bounds = array<i64: 1>, scalar_prefetch = 0 : i64, scratch_operands = 0 : i64, tpu.core_type = #tpu.core_type<tc>, window_params = [{transform_indices = @transform_0, window_bounds = array<i64: 128, 128>}, {pipeline_mode = #tpu.pipeline_mode<synchronous>, transform_indices = @transform_1, window_bounds = array<i64: 2, 128>}, {transform_indices = @transform_2, window_bounds = array<i64: 128, 128>}]} {
    %c0 = arith.constant 0 : index
    %c0_0 = arith.constant 0 : index
    %0 = vector.load %arg1[%c0, %c0_0] : memref<128x128xbf16, #tpu.memory_space<vmem>>, vector<128x128xbf16>
    %1 = arith.extf %0 : vector<128x128xbf16> to vector<128x128xf32>
    %c0_1 = arith.constant 0 : index
    %c0_2 = arith.constant 0 : index
    %2 = vector.load %arg2[%c0_1, %c0_2] : memref<2x128xf32, #tpu.memory_space<vmem>>, vector<1x128xf32>
    %3 = vector.broadcast %2 : vector<1x128xf32> to vector<128x128xf32>
    %4 = arith.mulf %1, %3 : vector<128x128xf32>
    %c1 = arith.constant 1 : index
    %c0_3 = arith.constant 0 : index
    %5 = vector.load %arg2[%c1, %c0_3] : memref<2x128xf32, #tpu.memory_space<vmem>>, vector<1x128xf32>
    %6 = vector.broadcast %5 : vector<1x128xf32> to vector<128x128xf32>
    %7 = arith.addf %4, %6 : vector<128x128xf32>
    %cst = arith.constant 0.000000e+00 : f32
    %8 = vector.broadcast %cst : f32 to vector<128x128xf32>
    %9 = arith.maximumf %7, %8 : vector<128x128xf32>
    %c0_4 = arith.constant 0 : index
    %c0_5 = arith.constant 0 : index
    %10 = vector.load %arg3[%c0_4, %c0_5] : memref<128x128xf32, #tpu.memory_space<vmem>>, vector<128x128xf32>
    tpu.vector_store %arg3[%c0_4, %c0_5], %9 {strides = array<i32>} : memref<128x128xf32, #tpu.memory_space<vmem>>, vector<128x128xf32>,
    return
  }
  func.func @transform_0(%arg0: i32) -> (i32, i32) {
    %c0_i32 = arith.constant 0 : i32
    %c0_i32_0 = arith.constant 0 : i32
    return %arg0, %c0_i32 : i32, i32
  }
  func.func @transform_1(%arg0: i32) -> (i32, i32) {
    %c0_i32 = arith.constant 0 : i32
    %c0_i32_0 = arith.constant 0 : i32
    %c0_i32_1 = arith.constant 0 : i32
    return %c0_i32, %c0_i32_0 : i32, i32
  }
  func.func @transform_2(%arg0: i32) -> (i32, i32) {
    %c0_i32 = arith.constant 0 : i32
    %c0_i32_0 = arith.constant 0 : i32
    return %arg0, %c0_i32 : i32, i32
  }
}

</mosaic_0001>

<bundles_post_ra>
// kernel: spectral_gcn_layer.3
= control target key start
LH: loop header
LB: loop body
LE: loop exit
PB: predicated region body
PF: predicated region fallthrough
CT: control target
= control target key end

     0   :  { %s285_s0 = inlined_call_operand.vmem [shape: bf16[128,128], index: 0, kind: input, shape index: {}]   ;;  %s286_s1 = inlined_call_operand.vmem [shape: f32[2,128], index: 1, kind: input, shape index: {}]   ;;  %s287_s2 = inlined_call_operand.vmem [shape: f32[128,128], index: 2, kind: output, shape index: {}]  }
   0x1   :  { %v116_v0 = vld [vmem:[%s285_s0] sm:$0xff]   ;;  %v147_v5 = vld [vmem:[%s285_s0 + $0x8] sm:$0xff]   ;;  %v148_v8 = vld [vmem:[%s285_s0 + $0x10] sm:$0xff]  }
   0x2   :  { %v177_v1 = vld [vmem:[%s286_s1] ss:$0 sm:$0xff]  ;;  %v117_v2 = vunpack.c.l.bf16 %v116_v0  ;;  %v182_v3 = vld [vmem:[%s286_s1 + $0x1] ss:$0 sm:$0xff]  ;;  %v118_v4 = vunpack.c.h.bf16 %v116_v0  ;;  %v121_v6 = vunpack.c.l.bf16 %v147_v5  ;;  %v122_v7 = vunpack.c.h.bf16 %v147_v5  ;;  %v149_v9 = vld [vmem:[%s285_s0 + $0x18] sm:$0xff]  }
   0x3   :  { %v125_v12 = vunpack.c.l.bf16 %v148_v8  ;;  %v126_v13 = vunpack.c.h.bf16 %v148_v8  ;;  %v129_v16 = vunpack.c.l.bf16 %v149_v9  ;;  %v130_v17 = vunpack.c.h.bf16 %v149_v9  ;;  %v150_v26 = vld [vmem:[%s285_s0 + $0x20] sm:$0xff]   ;;  %v151_v31 = vld [vmem:[%s285_s0 + $0x28] sm:$0xff]   ;;  %v152_v36 = vld [vmem:[%s285_s0 + $0x30] sm:$0xff]  }
   0x4   :  { %v45_v10 = vmul.f32 %v177_v1, %v117_v2  ;;  %v46_v11 = vmul.f32 %v177_v1, %v118_v4  ;;  %v47_v14 = vmul.f32 %v177_v1, %v121_v6  ;;  %v48_v15 = vmul.f32 %v177_v1, %v122_v7  ;;  %v153_v41 = vld [vmem:[%s285_s0 + $0x38] sm:$0xff]  }
   0x5   :  { %v49_v20 = vmul.f32 %v177_v1, %v125_v12  ;;  %v50_v21 = vmul.f32 %v177_v1, %v126_v13  ;;  %v51_v24 = vmul.f32 %v177_v1, %v129_v16  ;;  %v52_v25 = vmul.f32 %v177_v1, %v130_v17 }
   0x6   :  { %v63_v18 = vadd.f32 %v182_v3, %v45_v10  ;;  %v64_v19 = vadd.f32 %v182_v3, %v46_v11  ;;  %v65_v22 = vadd.f32 %v182_v3, %v47_v14  ;;  %v66_v23 = vadd.f32 %v182_v3, %v48_v15 }
   0x7   :  { %v67_v29 = vadd.f32 %v182_v3, %v49_v20  ;;  %v68_v30 = vadd.f32 %v182_v3, %v50_v21  ;;  %v69_v34 = vadd.f32 %v182_v3, %v51_v24  ;;  %v70_v35 = vadd.f32 %v182_v3, %v52_v25 }
   0x8   :  { %v79_v27 = vmax.f32 %v63_v18, 0.0  ;;  %v80_v28 = vmax.f32 %v64_v19, 0.0  ;;  %v81_v32 = vmax.f32 %v65_v22, 0.0  ;;  %v82_v33 = vmax.f32 %v66_v23, 0.0 }
   0x9   :  { %v83_v37 = vmax.f32 %v67_v29, 0.0  ;;  %v84_v38 = vmax.f32 %v68_v30, 0.0  ;;  %v133_v39 = vunpack.c.l.bf16 %v150_v26  ;;  %v134_v40 = vunpack.c.h.bf16 %v150_v26 }
   0xa   :  { %95 = vst [vmem:[%s287_s2] sm:$0xff] %v79_v27  ;;  %v85_v42 = vmax.f32 %v69_v34, 0.0  ;;  %v86_v43 = vmax.f32 %v70_v35, 0.0  ;;  %v137_v44 = vunpack.c.l.bf16 %v151_v31  ;;  %v138_v45 = vunpack.c.h.bf16 %v151_v31 }
   0xb   :  { %96 = vst [vmem:[%s287_s2 + $0x8] sm:$0xff] %v80_v28  ;;  %v53_v46 = vmul.f32 %v177_v1, %v133_v39  ;;  %v54_v47 = vmul.f32 %v177_v1, %v134_v40  ;;  %v141_v48 = vunpack.c.l.bf16 %v152_v36  ;;  %v142_v49 = vunpack.c.h.bf16 %v152_v36 }
   0xc   :  { %97 = vst [vmem:[%s287_s2 + $0x10] sm:$0xff] %v81_v32  ;;  %v55_v50 = vmul.f32 %v177_v1, %v137_v44  ;;  %v56_v51 = vmul.f32 %v177_v1, %v138_v45  ;;  %v145_v52 = vunpack.c.l.bf16 %v153_v41  ;;  %v146_v53 = vunpack.c.h.bf16 %v153_v41 }
   0xd   :  { %98 = vst [vmem:[%s287_s2 + $0x18] sm:$0xff] %v82_v33  ;;  %v71_v54 = vadd.f32 %v182_v3, %v53_v46  ;;  %v72_v55 = vadd.f32 %v182_v3, %v54_v47  ;;  %v57_v56 = vmul.f32 %v177_v1, %v141_v48  ;;  %v58_v57 = vmul.f32 %v177_v1, %v142_v49 }
   0xe   :  { %99 = vst [vmem:[%s287_s2 + $0x20] sm:$0xff] %v83_v37  ;;  %v73_v58 = vadd.f32 %v182_v3, %v55_v50  ;;  %v74_v59 = vadd.f32 %v182_v3, %v56_v51  ;;  %v59_v60 = vmul.f32 %v177_v1, %v145_v52  ;;  %v60_v61 = vmul.f32 %v177_v1, %v146_v53 }
   0xf   :  { %100 = vst [vmem:[%s287_s2 + $0x28] sm:$0xff] %v84_v38  ;;  %v87_v62 = vmax.f32 %v71_v54, 0.0  ;;  %v88_v63 = vmax.f32 %v72_v55, 0.0  ;;  %v75_v0 = vadd.f32 %v182_v3, %v57_v56  ;;  %v76_v2 = vadd.f32 %v182_v3, %v58_v57 }
  0x10   :  { %101 = vst [vmem:[%s287_s2 + $0x30] sm:$0xff] %v85_v42  ;;  %v89_v4 = vmax.f32 %v73_v58, 0.0  ;;  %v90_v5 = vmax.f32 %v74_v59, 0.0  ;;  %v77_v6 = vadd.f32 %v182_v3, %v59_v60  ;;  %v78_v1 = vadd.f32 %v182_v3, %v60_v61 }
  0x11   :  { %102 = vst [vmem:[%s287_s2 + $0x38] sm:$0xff] %v86_v43  ;;  %v91_v7 = vmax.f32 %v75_v0, 0.0  ;;  %v92_v8 = vmax.f32 %v76_v2, 0.0 }
  0x12   :  { %103 = vst [vmem:[%s287_s2 + $0x40] sm:$0xff] %v87_v62  ;;  %v93_v9 = vmax.f32 %v77_v6, 0.0  ;;  %v94_v3 = vmax.f32 %v78_v1, 0.0 }
  0x13   :  { %104 = vst [vmem:[%s287_s2 + $0x48] sm:$0xff] %v88_v63 }
  0x14   :  { %105 = vst [vmem:[%s287_s2 + $0x50] sm:$0xff] %v89_v4 }
  0x15   :  { %106 = vst [vmem:[%s287_s2 + $0x58] sm:$0xff] %v90_v5 }
  0x16   :  { %107 = vst [vmem:[%s287_s2 + $0x60] sm:$0xff] %v91_v7 }
  0x17   :  { %108 = vst [vmem:[%s287_s2 + $0x68] sm:$0xff] %v92_v8 }
  0x18   :  { %109 = vst [vmem:[%s287_s2 + $0x70] sm:$0xff] %v93_v9 }
  0x19   :  { %110 = vst [vmem:[%s287_s2 + $0x78] sm:$0xff] %v94_v3 }

// kernel: spectral_gcn_layer.2
= control target key start
LH: loop header
LB: loop body
LE: loop exit
PB: predicated region body
PF: predicated region fallthrough
CT: control target
= control target key end

     0   :  { %v552_v1 = vmov 0   ;;  %vm387_vm0 = vcmask 1040384   ;;  %s725_s1 = inlined_call_operand.vmem [shape: bf16[128,128], index: 1, kind: input, shape index: {}]   ;;  %s726_s2 = inlined_call_operand.vmem [shape: f32[128,1], index: 2, kind: input, shape index: {}]   ;;  %s727_s0 = inlined_call_operand.vmem [shape: s8[128,128], index: 0, kind: input, shape index: {}]   ;;  %s728_s3 = inlined_call_operand.vmem [shape: bf16[128,128], index: 3, kind: output, shape index: {0}]   ;;  %s729_s4 = inlined_call_operand.vmem [shape: f32[1,2,128], index: 4, kind: output, shape index: {1}]  }
   0x1   :  { %v437_v0 = vld [vmem:[%s725_s1 + $0x38] sm:$0xff]  ;;  %549 = vset.pattern.permute.xlu0 %v552_v1  ;;  %550 = vset.pattern.permute.xlu1 %v552_v1  ;;  %v185_v2 = vld [vmem:[%s726_s2] sm:$0xff]  ;;  %v436_v3 = vld [vmem:[%s725_s1 + $0x30] sm:$0xff] }
   0x2   :  { %551 = vset.pattern.permute.xlu2 %v552_v1  ;;  %136 = vmatpush.bf16.msra.mxu0 %v437_v0  ;;  %v187_v4 = vld [vmem:[%s726_s2 + $0x10] sm:$0xff]  ;;  %v435_v5 = vld [vmem:[%s725_s1 + $0x28] sm:$0xff]  ;;  %v188_v7 = vld [vmem:[%s726_s2 + $0x18] sm:$0xff] }
   0x3   :  { %517 = vmatpush.bf16.msra.mxu1 %v437_v0  ;;  %518 = vmatpush.bf16.msra.mxu2 %v437_v0  ;;  %v186_v6 = vld [vmem:[%s726_s2 + $0x8] sm:$0xff]  ;;  %v434_v8 = vld [vmem:[%s725_s1 + $0x20] sm:$0xff]  ;;  %v433_v9 = vld [vmem:[%s725_s1 + $0x18] sm:$0xff] }
   0x4   :  { %519 = vmatpush.bf16.msra.mxu3 %v437_v0  ;;  %203 = vperm.xlu0 %549, %v185_v2   ;;  %v432_v10 = vld [vmem:[%s725_s1 + $0x10] sm:$0xff]  ;;  %v192_v12 = vld [vmem:[%s726_s2 + $0x38] sm:$0xff]  ;;  %v617_v13 = vld [vmem:[%s727_s0] sm:$0xff]  }
   0x5   :  { %213 = vperm.xlu1 %550, %v187_v4   ;;  %v191_v11 = vld [vmem:[%s726_s2 + $0x30] sm:$0xff]  ;;  %v622_v14 = vld [vmem:[%s727_s0 + $0x8] sm:$0xff]   ;;  %v189_v15 = vld [vmem:[%s726_s2 + $0x20] sm:$0xff]  ;;  %v487_v18 = vunpack.c.0.s8 %v617_v13  ;;  %v488_v19 = vunpack.c.1.s8 %v617_v13  ;;  %v491_v46 = vunpack.c.2.s8 %v617_v13  ;;  %v492_v47 = vunpack.c.3.s8 %v617_v13 }
   0x6   :  { %137 = vmatpush.bf16.msra.mxu0 %v436_v3  ;;  %v630_v16 = vld [vmem:[%s727_s0 + $0x10] sm:$0xff]   ;;  %v635_v17 = vld [vmem:[%s727_s0 + $0x18] sm:$0xff]   ;;  %v495_v20 = vunpack.c.0.s8 %v622_v14  ;;  %v496_v21 = vunpack.c.1.s8 %v622_v14  ;;  %223 = vperm.xlu2 %551, %v189_v15   ;;  %v431_v22 = vld [vmem:[%s725_s1 + $0x8] sm:$0xff]  ;;  %v499_v48 = vunpack.c.2.s8 %v622_v14  ;;  %v500_v49 = vunpack.c.3.s8 %v622_v14 }
   0x7   :  { %520 = vmatpush.bf16.msra.mxu1 %v436_v3  ;;  %521 = vmatpush.bf16.msra.mxu2 %v436_v3  ;;  %v503_v23 = vunpack.c.0.s8 %v630_v16  ;;  %v504_v24 = vunpack.c.1.s8 %v630_v16  ;;  %v511_v25 = vunpack.c.0.s8 %v635_v17  ;;  %v512_v26 = vunpack.c.1.s8 %v635_v17  ;;  %v194_v31 = vld [vmem:[%s726_s2 + $0x48] sm:$0xff]  ;;  %v195_v32 = vld [vmem:[%s726_s2 + $0x50] sm:$0xff]  ;;  %v430_v33 = vld [vmem:[%s725_s1] sm:$0xff] }
   0x8   :  { %522 = vmatpush.bf16.msra.mxu3 %v436_v3  ;;  %v48_v27 = vcvt.s32.f32 %v487_v18  ;;  %v49_v28 = vcvt.s32.f32 %v488_v19  ;;  %v52_v29 = vcvt.s32.f32 %v495_v20  ;;  %v53_v30 = vcvt.s32.f32 %v496_v21  ;;  %v190_v38 = vld [vmem:[%s726_s2 + $0x28] sm:$0xff]  ;;  %v197_v43 = vld [vmem:[%s726_s2 + $0x60] sm:$0xff]  ;;  %v200_v58 = vld [vmem:[%s726_s2 + $0x78] sm:$0xff] }
   0x9   :  { %v56_v34 = vcvt.s32.f32 %v503_v23  ;;  %v57_v35 = vcvt.s32.f32 %v504_v24  ;;  %v60_v36 = vcvt.s32.f32 %v511_v25  ;;  %v61_v37 = vcvt.s32.f32 %v512_v26  ;;  %v198_v44 = vld [vmem:[%s726_s2 + $0x68] sm:$0xff]  ;;  %v193_v45 = vld [vmem:[%s726_s2 + $0x40] sm:$0xff]  ;;  %v196_v63 = vld [vmem:[%s726_s2 + $0x58] sm:$0xff] }
   0xa   :  { %138 = vmatpush.bf16.msra.mxu0 %v435_v5  ;;  %v64_v39 = vpack.c.bf16 %v49_v28, %v48_v27  ;;  %v66_v40 = vpack.c.bf16 %v53_v30, %v52_v29  ;;  %v507_v50 = vunpack.c.2.s8 %v630_v16  ;;  %v508_v51 = vunpack.c.3.s8 %v630_v16  ;;  %v199_v4 = vld [vmem:[%s726_s2 + $0x70] sm:$0xff] }
   0xb   :  { %523 = vmatpush.bf16.msra.mxu1 %v435_v5  ;;  %524 = vmatpush.bf16.msra.mxu2 %v435_v5  ;;  %v68_v41 = vpack.c.bf16 %v57_v35, %v56_v34  ;;  %v70_v42 = vpack.c.bf16 %v61_v37, %v60_v36  ;;  %v515_v52 = vunpack.c.2.s8 %v635_v17  ;;  %v516_v53 = vunpack.c.3.s8 %v635_v17 }
   0xc   :  { %525 = vmatpush.bf16.msra.mxu3 %v435_v5  ;;  %208 = vperm.xlu0 %549, %v186_v6   ;;  %v50_v54 = vcvt.s32.f32 %v491_v46  ;;  %v51_v55 = vcvt.s32.f32 %v492_v47  ;;  %v54_v56 = vcvt.s32.f32 %v499_v48  ;;  %v55_v57 = vcvt.s32.f32 %v500_v49 }
   0xd   :  { %218 = vperm.xlu1 %550, %v188_v7   ;;  %v58_v59 = vcvt.s32.f32 %v507_v50  ;;  %v59_v60 = vcvt.s32.f32 %v508_v51  ;;  %v62_v61 = vcvt.s32.f32 %v515_v52  ;;  %v63_v62 = vcvt.s32.f32 %v516_v53 }
   0xe   :  { %139 = vmatpush.bf16.msra.mxu0 %v434_v8  ;;  %228 = vperm.xlu2 %551, %v190_v38   ;;  %v65_v0 = vpack.c.bf16 %v51_v55, %v50_v54  ;;  %v67_v1 = vpack.c.bf16 %v55_v57, %v54_v56 }
   0xf   :  { %526 = vmatpush.bf16.msra.mxu1 %v434_v8  ;;  %527 = vmatpush.bf16.msra.mxu2 %v434_v8  ;;  %v69_v2 = vpack.c.bf16 %v59_v60, %v58_v59  ;;  %v71_v3 = vpack.c.bf16 %v63_v62, %v62_v61 }
  0x10   :  { %528 = vmatpush.bf16.msra.mxu3 %v434_v8 }
  0x12   :  { %140 = vmatpush.bf16.msra.mxu0 %v433_v9 }
  0x13   :  { %529 = vmatpush.bf16.msra.mxu1 %v433_v9  ;;  %530 = vmatpush.bf16.msra.mxu2 %v433_v9 }
  0x14   :  { %531 = vmatpush.bf16.msra.mxu3 %v433_v9  ;;  %233 = vperm.xlu0 %549, %v191_v11  }
  0x15   :  { %238 = vperm.xlu1 %550, %v192_v12  }
  0x16   :  { %141 = vmatpush.bf16.msra.mxu0 %v432_v10  ;;  %243 = vperm.xlu2 %551, %v193_v45  }
  0x17   :  { %532 = vmatpush.bf16.msra.mxu1 %v432_v10  ;;  %533 = vmatpush.bf16.msra.mxu2 %v432_v10 }
  0x18   :  { %534 = vmatpush.bf16.msra.mxu3 %v432_v10 }
  0x1a   :  { %142 = vmatpush.bf16.msra.mxu0 %v431_v22 }
  0x1b   :  { %535 = vmatpush.bf16.msra.mxu1 %v431_v22  ;;  %536 = vmatpush.bf16.msra.mxu2 %v431_v22 }
  0x1c   :  { %537 = vmatpush.bf16.msra.mxu3 %v431_v22  ;;  %248 = vperm.xlu0 %549, %v194_v31  }
  0x1d   :  { %253 = vperm.xlu1 %550, %v195_v32  }
  0x1e   :  { %143 = vmatpush.bf16.msra.mxu0 %v430_v33  ;;  %258 = vperm.xlu2 %551, %v196_v63  }
  0x1f   :  { %538 = vmatpush.bf16.msra.mxu1 %v430_v33  ;;  %539 = vmatpush.bf16.msra.mxu2 %v430_v33 }
  0x20   :  { %540 = vmatpush.bf16.msra.mxu3 %v430_v33 }
  0x21   :  { %144 = vmatmul.bf16.vlgmr.msra.gmra.mxu0 %v64_v39 }
  0x22   :  { %154 = vmatmul.bf16.vlgmr.msra.gmra.mxu1 %v66_v40  ;;  %164 = vmatmul.bf16.vlgmr.msra.gmra.mxu2 %v68_v41 }
  0x23   :  { %174 = vmatmul.bf16.vlgmr.msra.gmra.mxu3 %v70_v42 }
  0x24   :  { %263 = vperm.xlu0 %549, %v197_v43  }
  0x25   :  { %268 = vperm.xlu1 %550, %v198_v44  }
  0x26   :  { %273 = vperm.xlu2 %551, %v199_v4  }
  0x2c   :  { %278 = vperm.xlu0 %549, %v200_v58  }
  0x31   :  { %149 = vmatmul.bf16.gmra.mxu0 %v65_v0 }
  0x32   :  { %159 = vmatmul.bf16.gmra.mxu1 %v67_v1  ;;  %169 = vmatmul.bf16.gmra.mxu2 %v69_v2 }
  0x33   :  { %179 = vmatmul.bf16.gmra.mxu3 %v71_v3 }
  0x60   :  { %v224_v9 = vpop.permute.xlu2 %223 }
  0x68   :  { %v229_v12 = vpop.permute.xlu2 %228 }
  0x70   :  { %v244_v25 = vpop.permute.xlu2 %243 }
  0x76   :  { %v204_v5 = vpop.permute.xlu0 %203 }
  0x77   :  { %v214_v6 = vpop.permute.xlu1 %213 }
  0x78   :  { %v259_v41 = vpop.permute.xlu2 %258 }
  0x7e   :  { %v209_v7 = vpop.permute.xlu0 %208 }
  0x7f   :  { %v219_v8 = vpop.permute.xlu1 %218 }
  0x80   :  { %v274_v0 = vpop.permute.xlu2 %273 }
  0x86   :  { %v234_v10 = vpop.permute.xlu0 %233 }
  0x87   :  { %v239_v11 = vpop.permute.xlu1 %238 }
  0x8e   :  { %v249_v15 = vpop.permute.xlu0 %248 }
  0x8f   :  { %v254_v16 = vpop.permute.xlu1 %253 }
  0x96   :  { %v264_v28 = vpop.permute.xlu0 %263 }
  0x97   :  { %v269_v30 = vpop.permute.xlu1 %268 }
  0x9e   :  { %v145_v13 = vpop.f32.mrf.mxu0  ;;  %v279_v63 = vpop.permute.xlu0 %278 }
  0x9f   :  { %v155_v14 = vpop.f32.mrf.mxu1  ;;  %v281_v22 = vmul.f32 %v204_v5, %v145_v13 }
  0xa0   :  { %v285_v17 = vmul.f32 %v224_v9, %v155_v14 }
  0xa1   :  { %v350_v43 = vmul.f32 %v281_v22, %v281_v22 }
  0xa2   :  { %v354_v60 = vmul.f32 %v285_v17, %v285_v17 }
  0xa5   :  { %v165_v18 = vpop.f32.mrf.mxu2 }
  0xa6   :  { %v175_v19 = vpop.f32.mrf.mxu3  ;;  %v147_v20 = vpop.f32.mrf.mxu0  ;;  %v289_v29 = vmul.f32 %v244_v25, %v165_v18 }
  0xa7   :  { %v157_v21 = vpop.f32.mrf.mxu1  ;;  %v282_v23 = vmul.f32 %v209_v7, %v147_v20  ;;  %v692_v33 = vmul.f32 %v264_v28, %v175_v19 }
  0xa8   :  { %v286_v24 = vmul.f32 %v229_v12, %v157_v21  ;;  %v358_v19 = vmul.f32 %v289_v29, %v289_v29 }
  0xa9   :  { %v441_v26 = vpack.c.bf16 %v282_v23, %v281_v22  ;;  %v351_v42 = vmul.f32 %v282_v23, %v282_v23  ;;  %v329_v45 = vadd.f32 %v282_v23, %v281_v22 }
  0xaa   :  { %v451_v27 = vpack.c.bf16 %v286_v24, %v285_v17  ;;  %v355_v1 = vmul.f32 %v286_v24, %v286_v24 }
  0xab   :  { %442 = vst [vmem:[%s728_s3] sm:$0xff] %v441_v26   ;;  %v366_v48 = vadd.f32 %v351_v42, %v350_v43 }
  0xac   :  { %479 = vst [vmem:[%s728_s3 + $0x10] sm:$0xff] %v451_v27  }
  0xad   :  { %v167_v31 = vpop.f32.mrf.mxu2 }
  0xae   :  { %v177_v32 = vpop.f32.mrf.mxu3  ;;  %v290_v34 = vmul.f32 %v249_v15, %v167_v31  ;;  %v150_v36 = vpop.f32.mrf.mxu0  ;;  %v362_v31 = vmul.f32 %v692_v33, %v692_v33 }
  0xaf   :  { %v694_v35 = vmul.f32 %v269_v30, %v177_v32  ;;  %v160_v37 = vpop.f32.mrf.mxu1  ;;  %v283_v40 = vmul.f32 %v214_v6, %v150_v36 }
  0xb0   :  { %v461_v38 = vpack.c.bf16 %v290_v34, %v289_v29  ;;  %v287_v52 = vmul.f32 %v234_v10, %v160_v37 }
  0xb1   :  { %v471_v39 = vpack.c.bf16 %v694_v35, %v692_v33  ;;  %v352_v44 = vmul.f32 %v283_v40, %v283_v40  ;;  %v330_v51 = vadd.f32 %v329_v45, %v283_v40  ;;  %v363_v36 = vmul.f32 %v694_v35, %v694_v35 }
  0xb2   :  { %481 = vst [vmem:[%s728_s3 + $0x20] sm:$0xff] %v461_v38   ;;  %v356_v10 = vmul.f32 %v287_v52, %v287_v52 }
  0xb3   :  { %483 = vst [vmem:[%s728_s3 + $0x30] sm:$0xff] %v471_v39   ;;  %v367_v55 = vadd.f32 %v366_v48, %v352_v44 }
  0xb5   :  { %v170_v46 = vpop.f32.mrf.mxu2 }
  0xb6   :  { %v180_v47 = vpop.f32.mrf.mxu3  ;;  %v152_v49 = vpop.f32.mrf.mxu0  ;;  %v291_v6 = vmul.f32 %v254_v16, %v170_v46  ;;  %v359_v16 = vmul.f32 %v290_v34, %v290_v34 }
  0xb7   :  { %v162_v50 = vpop.f32.mrf.mxu1  ;;  %v284_v53 = vmul.f32 %v219_v8, %v152_v49  ;;  %v295_v7 = vmul.f32 %v274_v0, %v180_v47 }
  0xb8   :  { %v288_v54 = vmul.f32 %v239_v11, %v162_v50 }
  0xb9   :  { %v446_v56 = vpack.c.bf16 %v284_v53, %v283_v40  ;;  %v331_v57 = vadd.f32 %v330_v51, %v284_v53  ;;  %v353_v58 = vmul.f32 %v284_v53, %v284_v53  ;;  %v364_v39 = vmul.f32 %v295_v7, %v295_v7 }
  0xba   :  { %v456_v59 = vpack.c.bf16 %v288_v54, %v287_v52 }
  0xbb   :  { %478 = vst [vmem:[%s728_s3 + $0x8] sm:$0xff] %v446_v56   ;;  %v332_v61 = vadd.f32 %v331_v57, %v285_v17  ;;  %v368_v62 = vadd.f32 %v367_v55, %v353_v58  ;;  %v357_v17 = vmul.f32 %v288_v54, %v288_v54 }
  0xbc   :  { %480 = vst [vmem:[%s728_s3 + $0x18] sm:$0xff] %v456_v59  }
  0xbd   :  { %v369_v2 = vadd.f32 %v368_v62, %v354_v60  ;;  %v333_v3 = vadd.f32 %v332_v61, %v286_v24  ;;  %v172_v4 = vpop.f32.mrf.mxu2  ;;  %v360_v24 = vmul.f32 %v291_v6, %v291_v6 }
  0xbe   :  { %v182_v5 = vpop.f32.mrf.mxu3  ;;  %v292_v8 = vmul.f32 %v259_v41, %v172_v4 }
  0xbf   :  { %v296_v9 = vmul.f32 %v279_v63, %v182_v5  ;;  %v334_v11 = vadd.f32 %v333_v3, %v287_v52  ;;  %v370_v12 = vadd.f32 %v369_v2, %v355_v1 }
  0xc0   :  { %v466_v13 = vpack.c.bf16 %v292_v8, %v291_v6  ;;  %v361_v28 = vmul.f32 %v292_v8, %v292_v8 }
  0xc1   :  { %v476_v14 = vpack.c.bf16 %v296_v9, %v295_v7  ;;  %v335_v15 = vadd.f32 %v334_v11, %v288_v54  ;;  %v371_v18 = vadd.f32 %v370_v12, %v356_v10  ;;  %v365_v42 = vmul.f32 %v296_v9, %v296_v9 }
  0xc2   :  { %482 = vst [vmem:[%s728_s3 + $0x28] sm:$0xff] %v466_v13  }
  0xc3   :  { %v336_v20 = vadd.f32 %v335_v15, %v289_v29  ;;  %v372_v21 = vadd.f32 %v371_v18, %v357_v17  ;;  %484 = vst [vmem:[%s728_s3 + $0x38] sm:$0xff] %v476_v14  }
  0xc5   :  { %v373_v22 = vadd.f32 %v372_v21, %v358_v19  ;;  %v337_v23 = vadd.f32 %v336_v20, %v290_v34 }
  0xc7   :  { %v338_v25 = vadd.f32 %v337_v23, %v291_v6  ;;  %v374_v26 = vadd.f32 %v373_v22, %v359_v16 }
  0xc9   :  { %v339_v27 = vadd.f32 %v338_v25, %v292_v8  ;;  %v375_v30 = vadd.f32 %v374_v26, %v360_v24 }
  0xcb   :  { %v340_v32 = vadd.f32 %v339_v27, %v692_v33  ;;  %v376_v29 = vadd.f32 %v375_v30, %v361_v28 }
  0xcd   :  { %v377_v37 = vadd.f32 %v376_v29, %v362_v31  ;;  %v341_v38 = vadd.f32 %v340_v32, %v694_v35 }
  0xcf   :  { %v342_v34 = vadd.f32 %v341_v38, %v295_v7  ;;  %v378_v40 = vadd.f32 %v377_v37, %v363_v36 }
  0xd1   :  { %v343_v41 = vadd.f32 %v342_v34, %v296_v9  ;;  %v379_v43 = vadd.f32 %v378_v40, %v364_v39 }
  0xd3   :  { %v344_v44 = vrot.slane %v343_v41, 4  ;;  %v380_v45 = vadd.f32 %v379_v43, %v365_v42 }
  0xd5   :  { %v345_v46 = vadd.f32 %v344_v44, %v343_v41  ;;  %v381_v47 = vrot.slane %v380_v45, 4 }
  0xd7   :  { %v346_v48 = vrot.slane %v345_v46, 2  ;;  %v382_v49 = vadd.f32 %v381_v47, %v380_v45 }
  0xd9   :  { %v347_v33 = vadd.f32 %v346_v48, %v345_v46  ;;  %v383_v50 = vrot.slane %v382_v49, 2 }
  0xdb   :  { %v348_v51 = vrot.slane %v347_v33, 1  ;;  %v384_v52 = vadd.f32 %v383_v50, %v382_v49 }
  0xdd   :  { %v385_v53 = vrot.slane %v384_v52, 1  ;;  %v349_v54 = vadd.f32 %v348_v51, %v347_v33 }
  0xdf   :  { %v386_v35 = vadd.f32 %v385_v53, %v384_v52 }
  0xe1   :  { %v388_v55 = vsel %vm387_vm0, %v349_v54, %v386_v35 }
  0xe2   :  { %389 = vst [vmem:[%s729_s4] sm:$0x3] %v388_v55 }

</bundles_post_ra>
